<compile_context>
chip_gen: v6e
topology: v6e:2x2x1
jax: 0.10.0
libtpu: 0.0.40
codegen_flags: <defaults>
</compile_context>

<pallas_src>
import functools

import jax
import jax.numpy as jnp
from jax import lax
from jax.experimental import pallas as pl
from jax.experimental.pallas import tpu as pltpu


def _mha_kernel(x_ref, wqkv_ref, wff_ref, bff_ref, o_ref, *, num_heads):
    # x_ref:    (1, T, E)   one batch element per grid step
    # wqkv_ref: (E, 3E)     fused [Wq_allheads | Wk_allheads | Wv_allheads]
    # wff_ref:  (E, E)      output projection, stored (in, out) for x @ W
    # bff_ref:  (1, E)      output projection bias
    # o_ref:    (1, T, E)
    x = x_ref[0]                                              # (T, E)
    T, E = x.shape
    H = E // num_heads

    # One fused projection matmul for q/k/v of every head.
    qkv = jnp.dot(x, wqkv_ref[...], preferred_element_type=jnp.float32)  # (T, 3E)
    q = qkv[:, 0:E]
    k = qkv[:, E:2 * E]
    v = qkv[:, 2 * E:3 * E]

    # Causal (tril) mask built once per grid step from iotas (VPU-only),
    # reused by every head.
    row = lax.broadcasted_iota(jnp.int32, (T, T), 0)
    col = lax.broadcasted_iota(jnp.int32, (T, T), 1)
    causal = col <= row

    head_outs = []
    for h in range(num_heads):                                # static unroll
        sl = slice(h * H, (h + 1) * H)
        qh = q[:, sl]                                         # (T, H)
        kh = k[:, sl]
        vh = v[:, sl]

        # q @ k^T with the transpose folded into the MXU operand feed.
        s = lax.dot_general(
            qh, kh,
            dimension_numbers=(((1,), (1,)), ((), ())),
            preferred_element_type=jnp.float32,
        )                                                     # (T, T)
        # NOTE: no 1/sqrt(H) scaling — the reference module does not scale.
        s = jnp.where(causal, s, -jnp.inf)

        # Numerically stable softmax numerator; the diagonal guarantees at
        # least one unmasked element per row, so no NaNs.
        m = jnp.max(s, axis=-1, keepdims=True)
        p = jnp.exp(s - m)
        denom = jnp.sum(p, axis=-1, keepdims=True)            # (T, 1)

        # PV first, normalize after: (T, H) multiplies instead of (T, T);
        # reciprocal goes to the EUP slot.
        oh = jnp.dot(p, vh, preferred_element_type=jnp.float32)   # (T, H)
        oh = oh * pl.reciprocal(denom, approx=True)
        head_outs.append(oh)

    att = jnp.concatenate(head_outs, axis=-1)                 # (T, E)

    # Fused output projection (nn.Linear with bias); dropout(p=0) == identity.
    out = jnp.dot(att, wff_ref[...], preferred_element_type=jnp.float32)
    out = out + bff_ref[...]
    o_ref[0] = out.astype(o_ref.dtype)


def mha_forward(x, wq, wk, wv, wff, bff, *, num_heads):
    """Fused multi-head attention.

    x:        (B, T, E)
    wq/wk/wv: (num_heads, E, H)  per-head projection weights (transposed vs
              torch's nn.Linear weight so the kernel computes x @ W)
    wff:      (E, E)  output projection (transposed), bff: (E,) bias
    returns   (B, T, E)
    """
    B, T, E = x.shape
    H = E // num_heads
    assert wq.shape == (num_heads, E, H)
    assert wk.shape == (num_heads, E, H)
    assert wv.shape == (num_heads, E, H)
    assert wff.shape == (E, E) and bff.shape == (E,)

    # Fuse all heads + q/k/v into a single (E, 3E) weight; head h of each
    # projection occupies lanes [h*H:(h+1)*H] (matches torch's concat order).
    def _fuse(w):  # (nh, E, H) -> (E, nh*H)
        return jnp.transpose(w, (1, 0, 2)).reshape(E, num_heads * H)

    wqkv = jnp.concatenate([_fuse(wq), _fuse(wk), _fuse(wv)], axis=1)  # (E, 3E)
    bff2d = bff.reshape(1, E)

    grid_spec = pltpu.PrefetchScalarGridSpec(
        num_scalar_prefetch=0,
        grid=(B,),
        in_specs=[
            pl.BlockSpec((1, T, E), lambda b: (b, 0, 0)),       # x, per batch
            pl.BlockSpec((E, 3 * E), lambda b: (0, 0)),         # fused QKV, resident
            pl.BlockSpec((E, E), lambda b: (0, 0)),             # ff weight, resident
            pl.BlockSpec((1, E), lambda b: (0, 0)),             # ff bias, resident
        ],
        out_specs=pl.BlockSpec((1, T, E), lambda b: (b, 0, 0)),
    )

    return pl.pallas_call(
        functools.partial(_mha_kernel, num_heads=num_heads),
        out_shape=jax.ShapeDtypeStruct((B, T, E), x.dtype),
        grid_spec=grid_spec,
        compiler_params=pltpu.CompilerParams(
            dimension_semantics=("parallel",),
        ),
    )(x, wqkv, wff, bff2d)


def mha_reference(x, wq, wk, wv, wff, bff):
    """Pure-JAX reference mirroring the PyTorch MultiHeadAttention forward."""
    num_heads = wq.shape[0]
    T = x.shape[1]
    tril = jnp.tril(jnp.ones((T, T), dtype=bool))
    heads = []
    for h in range(num_heads):
        k = x @ wk[h]
        q = x @ wq[h]
        v = x @ wv[h]
        s = q @ jnp.swapaxes(k, -2, -1)
        s = jnp.where(tril, s, -jnp.inf)
        a = jax.nn.softmax(s, axis=-1)
        heads.append(a @ v)
    cat = jnp.concatenate(heads, axis=-1)
    return cat @ wff + bff


if __name__ == "__main__":
    # Small shapes consistent with the module: embed_size=32, num_heads=4
    # (head_embed_size=8), ctx_size=8 (T=8), batch=2.
    B, T, E, NH = 2, 8, 32, 4
    H = E // NH

    key = jax.random.PRNGKey(0)
    kx, kq, kk, kv, kf, kb = jax.random.split(key, 6)

    x = jax.random.normal(kx, (B, T, E), dtype=jnp.float32)

    # nn.Linear-style init, weights stored transposed (in, out) for x @ W.
    bound_h = 1.0 / jnp.sqrt(E)
    wq = jax.random.uniform(kq, (NH, E, H), jnp.float32, -bound_h, bound_h)
    wk = jax.random.uniform(kk, (NH, E, H), jnp.float32, -bound_h, bound_h)
    wv = jax.random.uniform(kv, (NH, E, H), jnp.float32, -bound_h, bound_h)
    bound_f = 1.0 / jnp.sqrt(NH * H)
    wff = jax.random.uniform(kf, (E, E), jnp.float32, -bound_f, bound_f)
    bff = jax.random.uniform(kb, (E,), jnp.float32, -bound_f, bound_f)

    out = mha_forward(x, wq, wk, wv, wff, bff, num_heads=NH)
    out = jax.block_until_ready(out)

    ref = mha_reference(x, wq, wk, wv, wff, bff)
    assert out.shape == (B, T, E)
    # Tolerance accounts for the EUP approximate reciprocal (approx=True).
    assert jnp.allclose(out, ref, atol=2e-3, rtol=2e-3), "mismatch vs reference"

    print("KERNEL_OK")
</pallas_src>

<mosaic_0001>
module attributes {stable_mosaic.version = 11 : i64} {
  func.func @_mha_kernel(%arg0: i32, %arg1: memref<1x8x32xf32, #tpu.memory_space<vmem>>, %arg2: memref<32x96xf32, #tpu.memory_space<vmem>>, %arg3: memref<32x32xf32, #tpu.memory_space<vmem>>, %arg4: memref<1x32xf32, #tpu.memory_space<vmem>>, %arg5: memref<1x8x32xf32, #tpu.memory_space<vmem>>) attributes {dimension_semantics = [#tpu.dimension_semantics<parallel>], iteration_bounds = array<i64: 2>, scalar_prefetch = 0 : i64, scratch_operands = 0 : i64, tpu.core_type = #tpu.core_type<tc>, window_params = [{transform_indices = @transform_0, window_bounds = array<i64: 1, 8, 32>}, {pipeline_mode = #tpu.pipeline_mode<synchronous>, transform_indices = @transform_1, window_bounds = array<i64: 32, 96>}, {pipeline_mode = #tpu.pipeline_mode<synchronous>, transform_indices = @transform_2, window_bounds = array<i64: 32, 32>}, {pipeline_mode = #tpu.pipeline_mode<synchronous>, transform_indices = @transform_3, window_bounds = array<i64: 1, 32>}, {transform_indices = @transform_4, window_bounds = array<i64: 1, 8, 32>}]} {
    %c0 = arith.constant 0 : index
    %c0_0 = arith.constant 0 : index
    %c0_1 = arith.constant 0 : index
    %0 = vector.load %arg1[%c0, %c0_0, %c0_1] : memref<1x8x32xf32, #tpu.memory_space<vmem>>, vector<1x8x32xf32>
    %1 = vector.shape_cast %0 : vector<1x8x32xf32> to vector<8x32xf32>
    %c0_2 = arith.constant 0 : index
    %c0_3 = arith.constant 0 : index
    %2 = vector.load %arg2[%c0_2, %c0_3] : memref<32x96xf32, #tpu.memory_space<vmem>>, vector<32x96xf32>
    %cst = arith.constant dense<0.000000e+00> : vector<8x96xf32>
    %3 = tpu.matmul %1, %2, %cst {dimension_numbers = #tpu.dot_dimension_numbers<[1], [0], [0], [1], [0, 0, 1, 1], [], []>} : vector<8x32xf32>, vector<32x96xf32>, vector<8x96xf32> -> vector<8x96xf32>
    %4 = vector.extract_strided_slice %3 {offsets = [0, 0], sizes = [8, 32], strides = [1, 1]} : vector<8x96xf32> to vector<8x32xf32>
    %5 = vector.extract_strided_slice %3 {offsets = [0, 32], sizes = [8, 32], strides = [1, 1]} : vector<8x96xf32> to vector<8x32xf32>
    %6 = vector.extract_strided_slice %3 {offsets = [0, 64], sizes = [8, 32], strides = [1, 1]} : vector<8x96xf32> to vector<8x32xf32>
    %7 = tpu.iota {dimensions = array<i32: 0>} : vector<8x8xi32>
    %8 = tpu.iota {dimensions = array<i32: 1>} : vector<8x8xi32>
    %9 = arith.cmpi sle, %8, %7 : vector<8x8xi32>
    %10 = vector.extract_strided_slice %4 {offsets = [0, 0], sizes = [8, 8], strides = [1, 1]} : vector<8x32xf32> to vector<8x8xf32>
    %11 = vector.extract_strided_slice %5 {offsets = [0, 0], sizes = [8, 8], strides = [1, 1]} : vector<8x32xf32> to vector<8x8xf32>
    %12 = vector.extract_strided_slice %6 {offsets = [0, 0], sizes = [8, 8], strides = [1, 1]} : vector<8x32xf32> to vector<8x8xf32>
    %cst_4 = arith.constant dense<0.000000e+00> : vector<8x8xf32>
    %13 = tpu.matmul %10, %11, %cst_4 {dimension_numbers = #tpu.dot_dimension_numbers<[1], [1], [0], [0], [0, 0, 1, 0], [], []>} : vector<8x8xf32>, vector<8x8xf32>, vector<8x8xf32> -> vector<8x8xf32>
    %cst_5 = arith.constant 0xFF800000 : f32
    %14 = vector.broadcast %cst_5 : f32 to vector<8x8xf32>
    %15 = arith.select %9, %13, %14 : vector<8x8xi1>, vector<8x8xf32>
    %cst_6 = arith.constant dense<0xFF800000> : vector<8xf32>
    %16 = vector.multi_reduction <maximumf>, %15, %cst_6 [1] : vector<8x8xf32> to vector<8xf32>
    %17 = vector.shape_cast %16 : vector<8xf32> to vector<8x1xf32>
    %18 = vector.broadcast %17 : vector<8x1xf32> to vector<8x8xf32>
    %19 = arith.subf %15, %18 : vector<8x8xf32>
    %20 = math.exp %19 : vector<8x8xf32>
    %cst_7 = arith.constant dense<0.000000e+00> : vector<8xf32>
    %21 = vector.multi_reduction <add>, %20, %cst_7 [1] : vector<8x8xf32> to vector<8xf32>
    %22 = vector.shape_cast %21 : vector<8xf32> to vector<8x1xf32>
    %cst_8 = arith.constant dense<0.000000e+00> : vector<8x8xf32>
    %23 = tpu.matmul %20, %12, %cst_8 {dimension_numbers = #tpu.dot_dimension_numbers<[1], [0], [0], [1], [0, 0, 1, 1], [], []>} : vector<8x8xf32>, vector<8x8xf32>, vector<8x8xf32> -> vector<8x8xf32>
    %24 = tpu.reciprocal %22 {approx = true} : vector<8x1xf32> -> vector<8x1xf32>
    %25 = vector.broadcast %24 : vector<8x1xf32> to vector<8x8xf32>
    %26 = arith.mulf %23, %25 : vector<8x8xf32>
    %27 = vector.extract_strided_slice %4 {offsets = [0, 8], sizes = [8, 8], strides = [1, 1]} : vector<8x32xf32> to vector<8x8xf32>
    %28 = vector.extract_strided_slice %5 {offsets = [0, 8], sizes = [8, 8], strides = [1, 1]} : vector<8x32xf32> to vector<8x8xf32>
    %29 = vector.extract_strided_slice %6 {offsets = [0, 8], sizes = [8, 8], strides = [1, 1]} : vector<8x32xf32> to vector<8x8xf32>
    %cst_9 = arith.constant dense<0.000000e+00> : vector<8x8xf32>
    %30 = tpu.matmul %27, %28, %cst_9 {dimension_numbers = #tpu.dot_dimension_numbers<[1], [1], [0], [0], [0, 0, 1, 0], [], []>} : vector<8x8xf32>, vector<8x8xf32>, vector<8x8xf32> -> vector<8x8xf32>
    %cst_10 = arith.constant 0xFF800000 : f32
    %31 = vector.broadcast %cst_10 : f32 to vector<8x8xf32>
    %32 = arith.select %9, %30, %31 : vector<8x8xi1>, vector<8x8xf32>
    %cst_11 = arith.constant dense<0xFF800000> : vector<8xf32>
    %33 = vector.multi_reduction <maximumf>, %32, %cst_11 [1] : vector<8x8xf32> to vector<8xf32>
    %34 = vector.shape_cast %33 : vector<8xf32> to vector<8x1xf32>
    %35 = vector.broadcast %34 : vector<8x1xf32> to vector<8x8xf32>
    %36 = arith.subf %32, %35 : vector<8x8xf32>
    %37 = math.exp %36 : vector<8x8xf32>
    %cst_12 = arith.constant dense<0.000000e+00> : vector<8xf32>
    %38 = vector.multi_reduction <add>, %37, %cst_12 [1] : vector<8x8xf32> to vector<8xf32>
    %39 = vector.shape_cast %38 : vector<8xf32> to vector<8x1xf32>
    %cst_13 = arith.constant dense<0.000000e+00> : vector<8x8xf32>
    %40 = tpu.matmul %37, %29, %cst_13 {dimension_numbers = #tpu.dot_dimension_numbers<[1], [0], [0], [1], [0, 0, 1, 1], [], []>} : vector<8x8xf32>, vector<8x8xf32>, vector<8x8xf32> -> vector<8x8xf32>
    %41 = tpu.reciprocal %39 {approx = true} : vector<8x1xf32> -> vector<8x1xf32>
    %42 = vector.broadcast %41 : vector<8x1xf32> to vector<8x8xf32>
    %43 = arith.mulf %40, %42 : vector<8x8xf32>
    %44 = vector.extract_strided_slice %4 {offsets = [0, 16], sizes = [8, 8], strides = [1, 1]} : vector<8x32xf32> to vector<8x8xf32>
    %45 = vector.extract_strided_slice %5 {offsets = [0, 16], sizes = [8, 8], strides = [1, 1]} : vector<8x32xf32> to vector<8x8xf32>
    %46 = vector.extract_strided_slice %6 {offsets = [0, 16], sizes = [8, 8], strides = [1, 1]} : vector<8x32xf32> to vector<8x8xf32>
    %cst_14 = arith.constant dense<0.000000e+00> : vector<8x8xf32>
    %47 = tpu.matmul %44, %45, %cst_14 {dimension_numbers = #tpu.dot_dimension_numbers<[1], [1], [0], [0], [0, 0, 1, 0], [], []>} : vector<8x8xf32>, vector<8x8xf32>, vector<8x8xf32> -> vector<8x8xf32>
    %cst_15 = arith.constant 0xFF800000 : f32
    %48 = vector.broadcast %cst_15 : f32 to vector<8x8xf32>
    %49 = arith.select %9, %47, %48 : vector<8x8xi1>, vector<8x8xf32>
    %cst_16 = arith.constant dense<0xFF800000> : vector<8xf32>
    %50 = vector.multi_reduction <maximumf>, %49, %cst_16 [1] : vector<8x8xf32> to vector<8xf32>
    %51 = vector.shape_cast %50 : vector<8xf32> to vector<8x1xf32>
    %52 = vector.broadcast %51 : vector<8x1xf32> to vector<8x8xf32>
    %53 = arith.subf %49, %52 : vector<8x8xf32>
    %54 = math.exp %53 : vector<8x8xf32>
    %cst_17 = arith.constant dense<0.000000e+00> : vector<8xf32>
    %55 = vector.multi_reduction <add>, %54, %cst_17 [1] : vector<8x8xf32> to vector<8xf32>
    %56 = vector.shape_cast %55 : vector<8xf32> to vector<8x1xf32>
    %cst_18 = arith.constant dense<0.000000e+00> : vector<8x8xf32>
    %57 = tpu.matmul %54, %46, %cst_18 {dimension_numbers = #tpu.dot_dimension_numbers<[1], [0], [0], [1], [0, 0, 1, 1], [], []>} : vector<8x8xf32>, vector<8x8xf32>, vector<8x8xf32> -> vector<8x8xf32>
    %58 = tpu.reciprocal %56 {approx = true} : vector<8x1xf32> -> vector<8x1xf32>
    %59 = vector.broadcast %58 : vector<8x1xf32> to vector<8x8xf32>
    %60 = arith.mulf %57, %59 : vector<8x8xf32>
    %61 = vector.extract_strided_slice %4 {offsets = [0, 24], sizes = [8, 8], strides = [1, 1]} : vector<8x32xf32> to vector<8x8xf32>
    %62 = vector.extract_strided_slice %5 {offsets = [0, 24], sizes = [8, 8], strides = [1, 1]} : vector<8x32xf32> to vector<8x8xf32>
    %63 = vector.extract_strided_slice %6 {offsets = [0, 24], sizes = [8, 8], strides = [1, 1]} : vector<8x32xf32> to vector<8x8xf32>
    %cst_19 = arith.constant dense<0.000000e+00> : vector<8x8xf32>
    %64 = tpu.matmul %61, %62, %cst_19 {dimension_numbers = #tpu.dot_dimension_numbers<[1], [1], [0], [0], [0, 0, 1, 0], [], []>} : vector<8x8xf32>, vector<8x8xf32>, vector<8x8xf32> -> vector<8x8xf32>
    %cst_20 = arith.constant 0xFF800000 : f32
    %65 = vector.broadcast %cst_20 : f32 to vector<8x8xf32>
    %66 = arith.select %9, %64, %65 : vector<8x8xi1>, vector<8x8xf32>
    %cst_21 = arith.constant dense<0xFF800000> : vector<8xf32>
    %67 = vector.multi_reduction <maximumf>, %66, %cst_21 [1] : vector<8x8xf32> to vector<8xf32>
    %68 = vector.shape_cast %67 : vector<8xf32> to vector<8x1xf32>
    %69 = vector.broadcast %68 : vector<8x1xf32> to vector<8x8xf32>
    %70 = arith.subf %66, %69 : vector<8x8xf32>
    %71 = math.exp %70 : vector<8x8xf32>
    %cst_22 = arith.constant dense<0.000000e+00> : vector<8xf32>
    %72 = vector.multi_reduction <add>, %71, %cst_22 [1] : vector<8x8xf32> to vector<8xf32>
    %73 = vector.shape_cast %72 : vector<8xf32> to vector<8x1xf32>
    %cst_23 = arith.constant dense<0.000000e+00> : vector<8x8xf32>
    %74 = tpu.matmul %71, %63, %cst_23 {dimension_numbers = #tpu.dot_dimension_numbers<[1], [0], [0], [1], [0, 0, 1, 1], [], []>} : vector<8x8xf32>, vector<8x8xf32>, vector<8x8xf32> -> vector<8x8xf32>
    %75 = tpu.reciprocal %73 {approx = true} : vector<8x1xf32> -> vector<8x1xf32>
    %76 = vector.broadcast %75 : vector<8x1xf32> to vector<8x8xf32>
    %77 = arith.mulf %74, %76 : vector<8x8xf32>
    %78 = tpu.concatenate %26, %43, %60, %77 in 1 : vector<8x8xf32>, vector<8x8xf32>, vector<8x8xf32>, vector<8x8xf32> -> vector<8x32xf32>
    %c0_24 = arith.constant 0 : index
    %c0_25 = arith.constant 0 : index
    %79 = vector.load %arg3[%c0_24, %c0_25] : memref<32x32xf32, #tpu.memory_space<vmem>>, vector<32x32xf32>
    %cst_26 = arith.constant dense<0.000000e+00> : vector<8x32xf32>
    %80 = tpu.matmul %78, %79, %cst_26 {dimension_numbers = #tpu.dot_dimension_numbers<[1], [0], [0], [1], [0, 0, 1, 1], [], []>} : vector<8x32xf32>, vector<32x32xf32>, vector<8x32xf32> -> vector<8x32xf32>
    %c0_27 = arith.constant 0 : index
    %c0_28 = arith.constant 0 : index
    %81 = vector.load %arg4[%c0_27, %c0_28] : memref<1x32xf32, #tpu.memory_space<vmem>>, vector<1x32xf32>
    %82 = vector.broadcast %81 : vector<1x32xf32> to vector<8x32xf32>
    %83 = arith.addf %80, %82 : vector<8x32xf32>
    %c0_29 = arith.constant 0 : index
    %c0_30 = arith.constant 0 : index
    %c0_31 = arith.constant 0 : index
    %84 = vector.load %arg5[%c0_29, %c0_30, %c0_31] : memref<1x8x32xf32, #tpu.memory_space<vmem>>, vector<1x8x32xf32>
    %85 = vector.shape_cast %84 : vector<1x8x32xf32> to vector<8x32xf32>
    %86 = vector.shape_cast %83 : vector<8x32xf32> to vector<1x8x32xf32>
    tpu.vector_store %arg5[%c0_29, %c0_30, %c0_31], %86 {strides = array<i32>} : memref<1x8x32xf32, #tpu.memory_space<vmem>>, vector<1x8x32xf32>,
    return
  }
  func.func @transform_0(%arg0: i32) -> (i32, i32, i32) {
    %c0_i32 = arith.constant 0 : i32
    %c0_i32_0 = arith.constant 0 : i32
    %c0_i32_1 = arith.constant 0 : i32
    return %arg0, %c0_i32, %c0_i32_0 : i32, i32, i32
  }
  func.func @transform_1(%arg0: i32) -> (i32, i32) {
    %c0_i32 = arith.constant 0 : i32
    %c0_i32_0 = arith.constant 0 : i32
    %c0_i32_1 = arith.constant 0 : i32
    return %c0_i32, %c0_i32_0 : i32, i32
  }
  func.func @transform_2(%arg0: i32) -> (i32, i32) {
    %c0_i32 = arith.constant 0 : i32
    %c0_i32_0 = arith.constant 0 : i32
    %c0_i32_1 = arith.constant 0 : i32
    return %c0_i32, %c0_i32_0 : i32, i32
  }
  func.func @transform_3(%arg0: i32) -> (i32, i32) {
    %c0_i32 = arith.constant 0 : i32
    %c0_i32_0 = arith.constant 0 : i32
    %c0_i32_1 = arith.constant 0 : i32
    return %c0_i32, %c0_i32_0 : i32, i32
  }
  func.func @transform_4(%arg0: i32) -> (i32, i32, i32) {
    %c0_i32 = arith.constant 0 : i32
    %c0_i32_0 = arith.constant 0 : i32
    %c0_i32_1 = arith.constant 0 : i32
    return %arg0, %c0_i32, %c0_i32_0 : i32, i32, i32
  }
}

</mosaic_0001>

<bundles_post_ra>
// kernel: tpu_custom_call.1
= control target key start
LH: loop header
LB: loop body
LE: loop exit
PB: predicated region body
PF: predicated region fallthrough
CT: control target
= control target key end

     0   :  { %9 = vsyncpa [#allocation3], 0  ;;  %s1871_s0 = inlined_call_operand.hbm [shape: f32[2,8,32], index: 0, kind: input, shape index: {}]   ;;  %s1872_s1 = inlined_call_operand.hbm [shape: f32[32,96], index: 1, kind: input, shape index: {}]   ;;  %s1873_s2 = inlined_call_operand.hbm [shape: f32[32,32], index: 2, kind: input, shape index: {}]   ;;  %s1874_s3 = inlined_call_operand.vmem [shape: f32[1,32], index: 3, kind: input, shape index: {}]   ;;  %s1875_s4 = inlined_call_operand.hbm [shape: f32[2,8,32], index: 4, kind: output, shape index: {}]  }
   0x1   :  { %11 = vsyncpa [#allocation3 + $0x1], 0 }
   0x2   :  { %12 = vsyncpa [#allocation6], 0 }
   0x3   :  { %13 = vsyncpa [#allocation4], 0 }
   0x4   :  { %15 = vsyncpa [#allocation4 + $0x1], 0  ;;  %s1612_s15 = smov 0   ;;  %s1614_s16 = smov 0  }
   0x5   :  { %s1616_s17 = smov 0   ;;  %s1618_s18 = smov 0  }
   0x6 LB: > { %s1633_s19 = sadd.s32 4294967295, %s1563_s18   ;;  %s1195_s20 = sadd.s32 4294967294, %s1563_s18   ;;  %s1563_s18 = sphi %s1618_s18, %s1897_s18   ;;  %s1559_s17 = sphi %s1616_s17, %s1896_s17   ;;  %s1555_s16 = sphi %s1614_s16, %s1895_s16   ;;  %s1551_s15 = sphi %s1612_s15, %s1894_s15  }
   0x7   : > { %p41_p0 = scmp.ne.s32.totalorder %s1555_s16, %s1551_s15  ;;  %p1876_p1 = scmp.eq.s32.totalorder %s1633_s19, 0 }
   0x8   : > { %p134_p3 = scmp.eq.s32.totalorder %s1195_s20, 1  ;;  %p1196_p5 = scmp.ge.s32.totalorder %s1563_s18, 1 }
   0x9   : > { %p1642_p4 = por %p1876_p1, %p41_p0  ;;  %p141_p7 = scmp.lt.s32.totalorder %s1563_s18, 3 }
   0xa   : > { %p1647_p6 = por %p134_p3, %p41_p0  ;;  %s1565_s24 = smov [#allocation5]  }
   0xb   : > { %s1880_s21 = scalar_select %p1642_p4, 1, 0 }
   0xc   : > { %s1881_s22 = scalar_select %p1647_p6, 1, 0 }
   0xd   : > { %p1652_p8 = pnand %p1196_p5, %p141_p7  ;;  %s153_s25 = sshll.u32 %s1565_s24, 4  ;;  %s154_s25 = int_to_ptr.vmem [resolvable:$true] %s153_s25 }
   0xe   : > { %s1566_s27 = smov [#allocation7]   ;;  %s1426_s29 = scalar_lea.vmem %s154_s25, 512 }
   0xf   : > { %s1882_s23 = scalar_select %p1652_p8, 1, 0 }
  0x10   : > { %p1326_p9 = pneg %p1652_p8  ;;  %s166_s28 = sshll.u32 %s1566_s27, 4  ;;  %s167_s28 = int_to_ptr.vmem [resolvable:$true] %s166_s28 }
  0x11   : > { %p1427_p13 = scmp.ne.s32.totalorder %s154_s25, %s1426_s29  ;;  %p1434_p5 = scmp.lt.s32.totalorder %s154_s25, %s154_s25 }
  0x12   : > { %p1661_p11 = pnand %p1326_p9, %p1876_p1  ;;  %p1435_p7 = scmp.lt.s32.totalorder %s1426_s29, %s1426_s29 }
  0x14   : > { %p1417_p12 = pneg %p1661_p11  ;;  %p1436_p10 = por %p1435_p7, %p1434_p5 }
  0x16   : > { %p1429_p0 = pnand %p1427_p13, %p1417_p12 }
  0x18   : > { %p1430_p3 = pneg %p1429_p0 }
  0x1a   : > { %p1437_p9 = pnand %p1436_p10, %p1430_p3 }
  0x1c   : > { %1440 = shalt.err (!%p1437_p9)
}
  0x1d   : > { %s1567_s30 = smov 128   ;;  %s1568_s5 = smov 8  }
  0x1e   : > { %1329 = dma.hbm_to_vmem [thread:$0]  (!%p1661_p11), %s1872_s1, 512, %s154_s25, [#allocation6], %s1567_s30, %s1567_s30, %s1568_s5  }
  0x1f   : > { %s1452_s8 = scalar_lea.vmem %s167_s28, 512  ;;  %p1460_p2 = scmp.lt.s32.totalorder %s167_s28, %s167_s28 }
  0x20   : > { %p1453_p1 = scmp.ne.s32.totalorder %s167_s28, %s1452_s8  ;;  %p1461_p6 = scmp.lt.s32.totalorder %s1452_s8, %s1452_s8 }
  0x22   : > { %p1455_p13 = pnand %p1453_p1, %p1417_p12  ;;  %p1462_p5 = por %p1461_p6, %p1460_p2 }
  0x24   : > { %p1456_p0 = pneg %p1455_p13 }
  0x26   : > { %p1463_p10 = pnand %p1462_p5, %p1456_p0 }
  0x28   : > { %1466 = shalt.err (!%p1463_p10)
}
  0x29   : > { %1332 = dma.hbm_to_vmem [thread:$0]  (!%p1661_p11), %s1873_s2, 512, %s167_s28, [#allocation6], %s1567_s30, %s1567_s30, %s1568_s5  }
  0x2a   : > { %s1684_s11 = sadd.s32 1, %s1563_s18   ;;  %s28_s12 = sadd.s32 1, %s1559_s17 }
  0x2b   : > { %s25_s13 = ssub.s32 %s1563_s18, %s1684_s11  ;;  %p35_p1 = scmp.ne.s32.totalorder %s1559_s17, %s1555_s16 }
  0x2c   : > { %p26_p2 = scmp.eq.s32.totalorder %s25_s13, 0  ;;  %p36_p6 = scmp.eq.s32.totalorder %s1563_s18, 0 }
  0x2d   : > { %p1884_p12 = scmp.eq.s32.totalorder %s1633_s19, 1  ;;  %p1343_p7 = scmp.lt.s32.totalorder %s1563_s18, 2 }
  0x2e   : > { %s1700_s20 = scalar_select %p26_p2, %s1559_s17, %s28_s12  }
  0x2f   : > { %p1694_p3 = por %p1884_p12, %p35_p1  ;;  %p37_p9 = por %p36_p6, %p35_p1 }
  0x30   : > { %s183_s24 = sand.u32 1, %s1559_s17   ;;  %s1201_s26 = sshll.u32 %s1563_s18, 7 }
  0x31   : > { %s1885_s14 = scalar_select %p1694_p3, 1, 0 }
  0x32   : > { %s1200_s25 = sshll.u32 %s183_s24, 3  ;;  %s1707_s29 = scalar_lea.hbm %s1871_s0, %s1201_s26 }
  0x33   : > { %s187_s30 = scalar_lea.vmem [#allocation2], %s1200_s25  ;;  %p1709_p11 = pnand %p1343_p7, %p37_p9 }
  0x34   : > { %s194_s5 = sshll.u32 %s187_s30, 4  ;;  %s184_s7 = scalar_lea.sflag [#allocation3], %s183_s24  ;;  %s195_s5 = int_to_ptr.vmem [resolvable:$true] %s194_s5 }
  0x35   : > { %s1467_s8 = scalar_lea.hbm %s1707_s29, 128  ;;  %p1469_p0 = pneg %p1709_p11 }
  0x36   : > { %p1468_p13 = scmp.ne.s32.totalorder %s1707_s29, %s1467_s8  ;;  %s1472_s12 = scalar_lea.hbm %s1871_s0, 256 }
  0x37   : > { %p1473_p1 = scmp.lt.s32.totalorder %s1707_s29, %s1871_s0  ;;  %p1474_p2 = scmp.lt.s32.totalorder %s1472_s12, %s1467_s8 }
  0x38   : > { %p1470_p5 = pnand %p1469_p0, %p1468_p13 }
  0x39   : > { %p1475_p6 = por %p1474_p2, %p1473_p1 }
  0x3a   : > { %p1471_p10 = pneg %p1470_p5 }
  0x3c   : > { %p1476_p12 = pnand %p1475_p6, %p1471_p10 }
  0x3e   : > { %1479 = shalt.err (!%p1476_p12)
}
  0x3f   : > { %s1480_s26 = scalar_lea.vmem %s195_s5, 128  ;;  %s1569_s24 = smov [#allocation2]  }
  0x40   : > { %p1481_p7 = scmp.ne.s32.totalorder %s195_s5, %s1480_s26  ;;  %s1485_s27 = sshll.u32 %s1569_s24, 4  ;;  %s1486_s27 = int_to_ptr.vmem [resolvable:$false] %s1485_s27 }
  0x41   : > { %s1487_s28 = scalar_lea.vmem %s1486_s27, 256  ;;  %p1488_p13 = scmp.lt.s32.totalorder %s195_s5, %s1486_s27 }
  0x42   : > { %p1483_p9 = pnand %p1481_p7, %p1469_p0  ;;  %p1489_p5 = scmp.lt.s32.totalorder %s1487_s28, %s1480_s26 }
  0x44   : > { %p1484_p3 = pneg %p1483_p9  ;;  %p1490_p4 = por %p1489_p5, %p1488_p13 }
  0x46   : > { %p1491_p8 = pnand %p1490_p4, %p1484_p3 }
  0x48   : > { %1494 = shalt.err (!%p1491_p8)
}
  0x49   : > { %1336 = dma.hbm_to_vmem [thread:$0]  (!%p1709_p11), %s1707_s29, 128, %s195_s5, %s184_s7  }
  0x4a   : > { %p1887_p10 = scmp.ne.s32.totalorder %s1882_s23, 0 }
  0x4b   : > { %s1730_s30 = sand.u32 (!%p1887_p10), 1, %s1555_s16   ;;  %p1888_p4 = scmp.ne.s32.totalorder (!%p1887_p10), %s1880_s21, 0 }
  0x4c   : > { %203 = sbr.rel (%p1887_p10) target bundleno = 1639 (0x667), region = 36  ;;  %s1203_s8 = sshll.u32 (!%p1887_p10), %s1730_s30, 3 }
  0x4d   : > { %s206_s9 = scalar_lea.sflag (!%p1887_p10), [#allocation3], %s1730_s30  ;;  %s209_s10 = scalar_lea.vmem (!%p1887_p10), [#allocation2], %s1203_s8 }
  0x51   : > { %1538 = dma.done.wait (%p1888_p4), %s206_s9, 128  }
  0x52   : > { %1540 = vsyncadd (%p1888_p4), %s206_s9, 4294967168  ;;  %p1889_p8 = scmp.eq.s32.totalorder %s1633_s19, 0 }
  0x54   : > { %1542 = dma.done.wait (%p1889_p8), [#allocation6], 1024   ;;  %p1890_p3 = pmov %p1889_p8 }
  0x55   : > { %v1570_v0 = vmov 0.0   ;;  %vm1571_vm0 = vmmov 0   ;;  %v246_v1 = vld [vmem:[#allocation5 + $0x18] sm:$0xff]  ;;  %v245_v2 = vld [vmem:[#allocation5 + $0x10] sm:$0xff]  ;;  %v244_v3 = vld [vmem:[#allocation5 + $0x8] sm:$0xff]  ;;  %vm247_vm1 = vcmask 261120   ;;  %v321_v16 = vlaneseq }
  0x56   : > { %1544 = vsyncadd (%p1890_p3), [#allocation6], 4294966272  ;;  %1252 = vmatprep.subr.mxu0 %v1570_v0  ;;  %1260 = vmatprep.mubr.msk.f32.mxu0 %vm1571_vm0, %v1570_v0  ;;  %v243_v4 = vld [vmem:[#allocation5] sm:$0xff]  ;;  %v242_v5 = vld [vmem:[%s209_s10] sm:$0xff]  ;;  %s1572_s21 = smov 64   ;;  %s1573_s23 = smov 96  }
  0x57   : > { %1263 = vmatprep.subr.mxu1 %v1570_v0  ;;  %1265 = vmatprep.mubr.msk.f32.mxu1 %vm1571_vm0, %v1570_v0  ;;  %s1574_s29 = smov 88   ;;  %s1575_s5 = smov 120   ;;  %vm329_vm2 = vcmask 64512   ;;  %v322_v17 = vshrl.u32 %v321_v16, 7  ;;  %v324_v18 = vand.u32 127, %v321_v16  ;;  %v1010_v62 = vld [vmem:[#allocation7 + $0x18] sm:$0xff] }
  0x58   : > { %1253 = vmatpush3.msra.mxu0 %v246_v1  ;;  %s1576_s6 = smov 80   ;;  %s1577_s7 = smov 112   ;;  %v1009_v1 = vld [vmem:[#allocation7 + $0x10] sm:$0xff]  ;;  %vm1003_vm4 = vcmask 130048   ;;  %vm1005_vm5 = vcmask 195584  }
  0x59   : > { %1254 = vmatprep.subr.mxu0 %v1570_v0  ;;  %s1578_s12 = smov 72   ;;  %s1579_s13 = smov 104   ;;  %vm325_vm3 = vcmp.le.s32.totalorder %v324_v18, %v322_v17 }
  0x5a   : > { %1255 = vmatpush3.msra.mxu0 %v245_v2  ;;  %s1580_s25 = smov 56   ;;  %s1581_s26 = smov 40   ;;  %v1008_v2 = vld [vmem:[#allocation7 + $0x8] sm:$0xff] }
  0x5b   : > { %1256 = vmatprep.subr.mxu0 %v1570_v0  ;;  %s1582_s24 = smov 48   ;;  %s1583_s27 = smov 8  }
  0x5c   : > { %1257 = vmatpush3.msra.mxu0 %v244_v3  ;;  %v1007_v3 = vld [vmem:[#allocation7] sm:$0xff]  ;;  %s1584_s28 = smov 16   ;;  %s1585_s9 = smov 24  }
  0x5d   : > { %1258 = vmatprep.subr.mxu0 %v1570_v0  ;;  %p1891_p0 = scmp.ne.s32.totalorder %s1885_s14, 0 }
  0x5e   : > { %1259 = vmatpush3.msra.mxu0 %v243_v4 }
  0x5f   : > { %1261 = vmatmul.mubr.msk.f32.vlgmr.msra.gmra.mxu0 %vm247_vm1, %v242_v5  ;;  %1283 = vmatprep.subr.mxu0 %v1570_v0 }
  0x60   : > { %1285 = vmatprep.mubr.msk.f32.mxu0 %vm1571_vm0, %v1570_v0 }
 0x11f   : > { %v1757_v6 = vpop.f32.mrf.mxu0 }
 0x120   : > { %414 = vrot.lane.b32.xlu1 %v1757_v6, %s1572_s21  ;;  %327 = vrot.lane.b32.xlu0 %v1757_v6, %s1573_s23  ;;  %s1223_s23 = sshll.u32 %s1633_s19, 7  ;;  %s1586_s19 = smov [#allocation8]  }
 0x121   : > { %v1262_v7 = vpop.f32.mrf.mxu0 }
 0x124   : > { %494 = vrot.lane.b32.xlu1 %v1757_v6, %s1574_s29  ;;  %s241_s29 = scalar_lea.vmem [#allocation8], %s1203_s8  ;;  %s1499_s8 = sshll.u32 %s1586_s19, 4  ;;  %s1500_s8 = int_to_ptr.vmem [resolvable:$false] %s1499_s8 }
 0x128   : > { %492 = vrot.lane.b32.xlu1 %v1757_v6, %s1575_s5  ;;  %s1106_s5 = sshll.u32 %s241_s29, 4  ;;  %s1107_s5 = int_to_ptr.vmem [resolvable:$true] %s1106_s5 }
 0x129   : > { %p1502_p6 = scmp.lt.s32.totalorder %s1107_s5, %s1500_s8 }
 0x12c   : > { %660 = vrot.lane.b32.xlu1 %v1757_v6, %s1576_s6 }
 0x130   : > { %658 = vrot.lane.b32.xlu1 %v1757_v6, %s1577_s7 }
 0x134   : > { %826 = vrot.lane.b32.xlu1 %v1757_v6, %s1578_s12  ;;  %s1833_s12 = scalar_lea.hbm %s1875_s4, %s1223_s23 }
 0x138   : > { %824 = vrot.lane.b32.xlu1 %v1757_v6, %s1579_s13  ;;  %s1093_s13 = scalar_lea.sflag [#allocation4], %s1730_s30 }
 0x192   : > { %v415_v8 = vpop.permute.xlu1 %414  ;;  %v328_v9 = vpop.permute.xlu0 %327 }
 0x193   : > { %1264 = vmatpush3.xpose.msk.msra.mxu1 %vm329_vm2, %v328_v9 }
 0x194   : > { %1268 = vmatprep.subr.mxu1 %v1570_v0 }
 0x196   : > { %v495_v10 = vpop.permute.xlu1 %494  ;;  %1266 = vmatmul.mubr.msk.f32.vlgmr.msra.gmra.mxu1 %vm329_vm2, %v1757_v6 }
 0x197   : > { %1269 = vmatpush3.msra.mxu1 %v415_v8  ;;  %1270 = vmatprep.mubr.msk.f32.mxu1 %vm1571_vm0, %v1570_v0 }
 0x198   : > { %1273 = vmatprep.subr.mxu1 %v1570_v0 }
 0x19a   : > { %v493_v11 = vpop.permute.xlu1 %492 }
 0x19e   : > { %v661_v12 = vpop.permute.xlu1 %660 }
 0x19f   : > { %1284 = vmatpush3.xpose.msk.msra.mxu0 %vm329_vm2, %v661_v12 }
 0x1a0   : > { %1293 = vmatprep.subr.mxu0 %v1570_v0 }
 0x1a2   : > { %v659_v13 = vpop.permute.xlu1 %658 }
 0x1a3   : > { %1286 = vmatmul.mubr.msk.f32.vlgmr.msra.gmra.mxu0 %vm329_vm2, %v659_v13 }
 0x1a4   : > { %1295 = vmatprep.mubr.msk.f32.mxu0 %vm1571_vm0, %v1570_v0 }
 0x1a6   : > { %v827_v14 = vpop.permute.xlu1 %826 }
 0x1a7   : > { %1294 = vmatpush3.xpose.msk.msra.mxu0 %vm329_vm2, %v827_v14 }
 0x1a8   : > { %1303 = vmatprep.subr.mxu0 %v1570_v0 }
 0x1aa   : > { %v825_v15 = vpop.permute.xlu1 %824 }
 0x1ab   : > { %1296 = vmatmul.mubr.msk.f32.vlgmr.msra.gmra.mxu0 %vm329_vm2, %v825_v15 }
 0x1ac   : > { %1311 = vmatprep.mubr.msk.f32.mxu0 %vm1571_vm0, %v1570_v0  ;;  %1304 = vmatpush3.msra.mxu0 %v1010_v62 }
 0x1ad   : > { %1305 = vmatprep.subr.mxu0 %v1570_v0 }
 0x1ae   : > { %1306 = vmatpush3.msra.mxu0 %v1009_v1 }
 0x1af   : > { %1307 = vmatprep.subr.mxu0 %v1570_v0 }
 0x1b0   : > { %1308 = vmatpush3.msra.mxu0 %v1008_v2 }
 0x1b1   : > { %1309 = vmatprep.subr.mxu0 %v1570_v0 }
 0x1b2   : > { %1310 = vmatpush3.msra.mxu0 %v1007_v3 }
 0x256   : > { %v400_v19 = vpop.f32.mrf.mxu1 }
 0x257   : > { %v404_v20 = vsel %vm325_vm3, %v400_v19, -inf }
 0x258   : > { %v1267_v21 = vpop.f32.mrf.mxu1  ;;  %v405_v22 = vsel %vm329_vm2, %v404_v20, -inf }
 0x259   : > { %406 = vmax.xlane.f32.xlu0 %v405_v22 }
 0x263   : > { %v732_v23 = vpop.f32.mrf.mxu0 }
 0x264   : > { %v736_v27 = vsel %vm325_vm3, %v732_v23, -inf }
 0x265   : > { %v1287_v24 = vpop.f32.mrf.mxu0  ;;  %v737_v28 = vsel %vm329_vm2, %v736_v27, -inf }
 0x266   : > { %v1220_v24 = vld [vmem:[%s1874_s3] ss:$0 sm:$0xff] }
 0x26b   : > { %v898_v25 = vpop.f32.mrf.mxu0 }
 0x26c   : > { %v902_v29 = vsel %vm325_vm3, %v898_v25, -inf }
 0x26d   : > { %v1297_v26 = vpop.f32.mrf.mxu0  ;;  %v903_v30 = vsel %vm329_vm2, %v902_v29, -inf }
 0x26f   : > { %580 = vrot.lane.b32.xlu0 %v1757_v6, %s1580_s25  ;;  %s1495_s25 = scalar_lea.vmem %s1107_s5, 128 }
 0x270   : > { %p1496_p11 = scmp.ne.s32.totalorder %s1107_s5, %s1495_s25 }
 0x272   : > { %p1497_p1 = pnand %p1496_p11, %p1891_p0 }
 0x274   : > { %p1498_p2 = pneg %p1497_p1 }
 0x28e   : > { %738 = vmax.xlane.f32.xlu0 %v737_v28 }
 0x292   : > { %904 = vmax.xlane.f32.xlu0 %v903_v30 }
 0x2a8   : > { %912 = vrot.lane.b32.xlu0 %v1757_v6, %s1581_s26  ;;  %s1501_s26 = scalar_lea.vmem %s1500_s8, 256 }
 0x2a9   : > { %p1503_p12 = scmp.lt.s32.totalorder %s1501_s26, %s1495_s25 }
 0x2ab   : > { %p1504_p7 = por %p1503_p12, %p1502_p6 }
 0x2ad   : > { %p1505_p9 = pnand %p1504_p7, %p1498_p2 }
 0x2e2   : > { %v407_v31 = vpop.xlane.xlu0 %406 }
 0x2e3   : > { %v408_v32 = vsub.f32 %v404_v20, %v407_v31 }
 0x2e5   : > { %v409_v33 = vmul.f32 1.442695, %v408_v32 }
 0x2e6   : > { %v581_v35 = vpop.permute.xlu0 %580 }
 0x2e7   : > { %1399 = vpow2.f32 %v409_v33 }
 0x2f4   : > { %v1400_v34 = vpop.eup %1399 }
 0x2f5   : > { %1271 = vmatmul.mubr.msk.f32.vlgmr.msra.gmra.mxu1 %vm329_vm2, %v1400_v34  ;;  %v411_v59 = vsel %vm329_vm2, %v1400_v34, 0.0 }
 0x2f6   : > { %1274 = vmatpush3.xpose.msk.msra.mxu1 %vm329_vm2, %v495_v10  ;;  %1275 = vmatprep.mubr.msk.f32.mxu1 %vm1571_vm0, %v1570_v0 }
 0x2f7   : > { %1278 = vmatprep.subr.mxu1 %v1570_v0 }
 0x2f9   : > { %1276 = vmatmul.mubr.msk.f32.vlgmr.msra.gmra.mxu1 %vm329_vm2, %v493_v11 }
 0x2fa   : > { %1279 = vmatpush3.msra.mxu1 %v581_v35  ;;  %1280 = vmatprep.mubr.msk.f32.mxu1 %vm1571_vm0, %v1570_v0 }
 0x2fb   : > { %1288 = vmatprep.subr.mxu1 %v1570_v0 }
 0x317   : > { %v739_v42 = vpop.xlane.xlu0 %738 }
 0x318   : > { %v740_v43 = vsub.f32 %v736_v27, %v739_v42 }
 0x31a   : > { %v741_v44 = vmul.f32 1.442695, %v740_v43 }
 0x31b   : > { %v905_v47 = vpop.xlane.xlu0 %904 }
 0x31c   : > { %1401 = vpow2.f32 %v741_v44  ;;  %v906_v48 = vsub.f32 %v902_v29, %v905_v47 }
 0x31e   : > { %v907_v51 = vmul.f32 1.442695, %v906_v48 }
 0x31f   : > { %v913_v57 = vpop.permute.xlu0 %912 }
 0x329   : > { %v1402_v45 = vpop.eup %1401 }
 0x32a   : > { %v743_v46 = vsel %vm329_vm2, %v1402_v45, 0.0 }
 0x3b5   : > { %v1801_v36 = vpop.f32.mrf.mxu1 }
 0x3b7   : > { %v1272_v37 = vpop.f32.mrf.mxu1 }
 0x3b9   : > { %v566_v38 = vpop.f32.mrf.mxu1 }
 0x3ba   : > { %v570_v39 = vsel %vm325_vm3, %v566_v38, -inf }
 0x3bb   : > { %v1277_v40 = vpop.f32.mrf.mxu1  ;;  %v571_v41 = vsel %vm329_vm2, %v570_v39, -inf }
 0x3bc   : > { %572 = vmax.xlane.f32.xlu1 %v571_v41 }
 0x3cd   : > { %746 = vrot.lane.b32.xlu1 %v1757_v6, %s1582_s24 }
 0x3f1   : > { %744 = vadd.xlane.f32.xlu1 %v743_v46 }
 0x445   : > { %v573_v49 = vpop.xlane.xlu1 %572 }
 0x446   : > { %v574_v50 = vsub.f32 %v570_v39, %v573_v49 }
 0x448   : > { %v575_v52 = vmul.f32 1.442695, %v574_v50 }
 0x449   : > { %v747_v54 = vpop.permute.xlu1 %746 }
 0x44a   : > { %1403 = vpow2.f32 %v575_v52 }
 0x44b   : > { %1405 = vpow2.f32 %v907_v51 }
 0x457   : > { %v1404_v53 = vpop.eup %1403 }
 0x458   : > { %1281 = vmatmul.mubr.msk.f32.vlgmr.msra.gmra.mxu1 %vm329_vm2, %v1404_v53  ;;  %v577_v55 = vsel %vm329_vm2, %v1404_v53, 0.0  ;;  %v1406_v56 = vpop.eup %1405 }
 0x459   : > { %1289 = vmatpush3.msra.mxu1 %v747_v54  ;;  %578 = vadd.xlane.f32.xlu0 %v577_v55  ;;  %v909_v58 = vsel %vm329_vm2, %v1406_v56, 0.0 }
 0x45a   : > { %1290 = vmatprep.mubr.msk.f32.mxu1 %vm1571_vm0, %v1570_v0  ;;  %1298 = vmatprep.subr.mxu1 %v1570_v0 }
 0x45c   : > { %1291 = vmatmul.mubr.msk.f32.vlgmr.msra.gmra.mxu1 %vm329_vm2, %v1402_v45 }
 0x45d   : > { %1299 = vmatpush3.msra.mxu1 %v913_v57  ;;  %910 = vadd.xlane.f32.xlu0 %v909_v58 }
 0x45e   : > { %1300 = vmatprep.mubr.msk.f32.mxu1 %vm1571_vm0, %v1570_v0 }
 0x460   : > { %1301 = vmatmul.mubr.msk.f32.vlgmr.msra.gmra.mxu1 %vm329_vm2, %v1406_v56 }
 0x461   : > { %412 = vadd.xlane.f32.xlu0 %v411_v59 }
 0x47a   : > { %v745_v61 = vpop.xlane.xlu1 %744 }
 0x4e2   : > { %v579_v60 = vpop.xlane.xlu0 %578 }
 0x4e3   : > { %1407 = vrcp.f32 %v579_v60 }
 0x4e4   : > { %1409 = vrcp.f32 %v745_v61 }
 0x4e6   : > { %v911_v63 = vpop.xlane.xlu0 %910 }
 0x4e7   : > { %1411 = vrcp.f32 %v911_v63 }
 0x4ea   : > { %v413_v0 = vpop.xlane.xlu0 %412 }
 0x4eb   : > { %1413 = vrcp.f32 %v413_v0 }
 0x4f0   : > { %v1408_v4 = vpop.eup %1407 }
 0x4f1   : > { %v1410_v8 = vpop.eup %1409 }
 0x4f4   : > { %v1412_v12 = vpop.eup %1411 }
 0x4f8   : > { %v1414_v16 = vpop.eup %1413 }
 0x4f9   : > { %v491_v18 = vmul.f32 %v1414_v16, %v1801_v36 }
 0x518   : > { %v652_v5 = vpop.f32.mrf.mxu1 }
 0x519   : > { %v657_v6 = vmul.f32 %v1408_v4, %v652_v5 }
 0x51a   : > { %v1282_v7 = vpop.f32.mrf.mxu1 }
 0x51b   : > { %991 = vrot.lane.b32.xlu0 %v657_v6, %s1583_s27 }
 0x51c   : > { %v818_v9 = vpop.f32.mrf.mxu1 }
 0x51d   : > { %v823_v10 = vmul.f32 %v1410_v8, %v818_v9 }
 0x51e   : > { %v1292_v11 = vpop.f32.mrf.mxu1 }
 0x51f   : > { %995 = vrot.lane.b32.xlu1 %v823_v10, %s1584_s28 }
 0x520   : > { %v984_v13 = vpop.f32.mrf.mxu1 }
 0x521   : > { %v989_v14 = vmul.f32 %v1412_v12, %v984_v13 }
 0x522   : > { %v1302_v15 = vpop.f32.mrf.mxu1 }
 0x523   : > { %999 = vrot.lane.b32.xlu0 %v989_v14, %s1585_s9 }
 0x58d   : > { %v992_v17 = vpop.permute.xlu0 %991 }
 0x58e   : > { %v1002_v20 = vsel %vm329_vm2, %v491_v18, %v992_v17 }
 0x591   : > { %v996_v19 = vpop.permute.xlu1 %995 }
 0x592   : > { %v1004_v21 = vsel %vm1003_vm4, %v1002_v20, %v996_v19 }
 0x595   : > { %v1000_v22 = vpop.permute.xlu0 %999 }
 0x596   : > { %v1006_v23 = vsel %vm1005_vm5, %v1004_v21, %v1000_v22 }
 0x597   : > { %1312 = vmatmul.mubr.msk.f32.vlgmr.msra.gmra.mxu0 %vm247_vm1, %v1006_v23 }
 0x657   : > { %v1087_v25 = vpop.f32.mrf.mxu0 }
 0x658   : > { %v1088_v26 = vadd.f32 %v1220_v24, %v1087_v25 }
 0x659   : > { %v1313_v27 = vpop.f32.mrf.mxu0 }
 0x65a   : > { %1091 = vst.msk [vmem:[%s241_s29] sm:$0xff] %vm247_vm1, %v1088_v26 }
 0x65b   : > { %1508 = shalt.err (!%p1505_p9)
}
 0x65c   : > { %s1509_s24 = scalar_lea.hbm %s1833_s12, 128  ;;  %s1513_s28 = scalar_lea.hbm %s1875_s4, 256 }
 0x65d   : > { %p1510_p13 = scmp.ne.s32.totalorder %s1833_s12, %s1509_s24  ;;  %p1514_p4 = scmp.lt.s32.totalorder %s1833_s12, %s1875_s4 }
 0x65e   : > { %p1515_p8 = scmp.lt.s32.totalorder %s1513_s28, %s1509_s24 }
 0x65f   : > { %p1511_p5 = pnand %p1510_p13, %p1891_p0 }
 0x660   : > { %p1516_p3 = por %p1515_p8, %p1514_p4 }
 0x661   : > { %p1512_p10 = pneg %p1511_p5 }
 0x663   : > { %p1517_p11 = pnand %p1516_p3, %p1512_p10 }
 0x665   : > { %1520 = shalt.err (!%p1517_p11)
}
 0x666   : > { %1324 = dma.vmem_to_hbm [thread:$0]  (%p1891_p0), %s1107_s5, 128, %s1833_s12, %s1093_s13  }
 0x667 PF: > { %s1118_s21 = sand.u32 1, %s1551_s15   ;;  %p1892_p1 = scmp.ne.s32.totalorder %s1881_s22, 0 }
 0x668   : > { %p1893_p2 = scmp.ge.s32.totalorder %s1563_s18, 2  ;;  %s1119_s23 = scalar_lea.sflag [#allocation4], %s1118_s21 }
 0x66a   : > { %p1338_p6 = pnand %p1893_p2, %p1892_p1 }
 0x66c   : > { %p1339_p12 = pneg %p1338_p6 }
 0x66e   : > { %1546 = dma.done.wait (%p1339_p12), %s1119_s23, 128  }
 0x66f   : > { %1548 = vsyncadd (%p1339_p12), %s1119_s23, 4294967168  ;;  %p18_p7 = scmp.ge.s32.totalorder %s1684_s11, 4   ;;  %s1894_s15 = smov %s1555_s16 }
 0x670   : > { %s1895_s16 = smov %s1559_s17  ;;  %s1896_s17 = smov %s1700_s20 }
 0x671   : > { %s1897_s18 = smov %s1684_s11  ;;  %20 = sbr.rel (!%p18_p7) target bundleno = 6 (0x6), region = 89 }
 0x676   :  { %1124 = vsyncpa [#allocation3], 1 }
 0x677   :  { %1126 = vsyncpa [#allocation3 + $0x1], 1 }
 0x678   :  { %1127 = vsyncpa [#allocation6], 1 }
 0x679   :  { %1128 = vsyncpa [#allocation4], 1 }
 0x67a   :  { %1130 = vsyncpa [#allocation4 + $0x1], 1 }

</bundles_post_ra>
